<compile_context>
chip_gen: v7x
topology: tpu7x:2x2x1
jax: 0.10.0
libtpu: 0.0.40
codegen_flags: <defaults>
</compile_context>

<pallas_src>
import jax
import jax.numpy as jnp
from jax.experimental import pallas as pl
from jax.experimental.pallas import tpu as pltpu

_LANE = 128
_SUBLANE = 8


def _round_up(x, m):
    return ((x + m - 1) // m) * m


def value_network_kernel(x_ref, w1_ref, b1_ref, w2_ref, b2_ref, out_ref):
    # x_ref : (TILE_B, D)   streamed batch tile (f32 or bf16)
    # w1_ref: (H, D)        VMEM-resident (PyTorch fc1.weight layout (out, in))
    # b1_ref: (H, 1)        VMEM-resident
    # w2_ref: (H, 1)        VMEM-resident (fc2.weight transposed)
    # b2_ref: (1,)          SMEM scalar
    # out   : (1, TILE_B)   lane-dense row of per-sample values
    x = x_ref[...]
    if x.dtype != jnp.float32:
        x = x.astype(jnp.float32)  # in-vreg upcast; HBM stream stays narrow
    # hidden^T = W1 @ x^T : contract D on both operands, so no explicit
    # transpose is materialized and the result is lane-major over batch.
    ht = jax.lax.dot_general(
        w1_ref[...], x,
        dimension_numbers=(((1,), (1,)), ((), ())),
        preferred_element_type=jnp.float32)                 # (H, TILE_B)
    ht = jnp.maximum(ht + b1_ref[...], 0.0)                 # bias + ReLU
    # fc2 (out_features == 1): VPU multiply + sublane (XLU) reduction instead
    # of a ~1%-utilized N=1 MXU matmul.
    v = jnp.sum(ht * w2_ref[...], axis=0, keepdims=True)    # (1, TILE_B)
    out_ref[...] = (v + b2_ref[0]).astype(out_ref.dtype)


def value_network_forward(x, w1, b1, w2, b2, *, tile_b=8192):
    """Forward pass of ValueNetwork.

    x  : (B, D) float32 or bfloat16
    w1 : (H, D) float32   (PyTorch fc1.weight layout: (out, in))
    b1 : (H, 1) float32
    w2 : (H, 1) float32   (fc2.weight transposed)
    b2 : (1,)   float32
    returns (B, 1) float32
    """
    B, D = x.shape
    H = w1.shape[0]
    assert w1.shape == (H, D) and b1.shape == (H, 1)
    assert w2.shape == (H, 1) and b2.shape == (1,)

    # Batch tile: multiple of 128 lanes (unmasked lane-dense output stores on
    # full tiles), auto-scaled down for small B. No wrapper-side padding of x:
    # the last ragged block is handled by Pallas (OOB output lanes unwritten).
    tb = min(_round_up(tile_b, _LANE), _round_up(B, _LANE))
    n_tiles = pl.cdiv(B, tb)

    itemsize = jnp.dtype(x.dtype).itemsize
    d_pad = _round_up(D, _LANE)  # (tb, D) block is lane-padded to 128 in VMEM
    vmem_needed = (
        2 * tb * d_pad * itemsize            # x block, double-buffered, lane-padded
        + 2 * _SUBLANE * tb * 4              # (1, tb) out block, double-buffered
        + (H * d_pad + 2 * H * _LANE) * 4    # resident W1 / b1 / W2 (lane-padded)
        + 2 * H * tb * 4                     # (H, tb) f32 intermediates
        + (1 << 20))                         # slack
    vmem_limit = int(min(max(vmem_needed, 16 << 20), 64 << 20))

    cost = pl.CostEstimate(
        flops=2 * B * D * H + 2 * B * H,
        transcendentals=0,
        bytes_accessed=B * D * itemsize + (H * D + 2 * H + 1) * 4 + B * 4,
    )

    out = pl.pallas_call(
        value_network_kernel,
        out_shape=jax.ShapeDtypeStruct((1, B), jnp.float32),
        grid_spec=pltpu.PrefetchScalarGridSpec(
            num_scalar_prefetch=0,
            grid=(n_tiles,),
            in_specs=[
                pl.BlockSpec((tb, D), lambda i: (i, 0)),            # x: streamed
                pl.BlockSpec((H, D), lambda i: (0, 0)),             # W1: resident
                pl.BlockSpec((H, 1), lambda i: (0, 0)),             # b1: resident
                pl.BlockSpec((H, 1), lambda i: (0, 0)),             # W2: resident
                pl.BlockSpec(memory_space=pltpu.MemorySpace.SMEM),  # b2 scalar
            ],
            out_specs=pl.BlockSpec((1, tb), lambda i: (0, i)),
        ),
        compiler_params=pltpu.CompilerParams(
            # Batch tiles are independent -> shard the grid across TCs on v7x.
            dimension_semantics=("parallel",),
            vmem_limit_bytes=vmem_limit,
        ),
        cost_estimate=cost,
    )(x, w1, b1, w2, b2)

    # (1, B) lane-major slab -> (B, 1) column.
    return out.reshape(B, 1)


def init_params(key, input_dim, hidden=64):
    """Deterministic synthetic params matching nn.Linear init and shapes.

    Layouts chosen for the kernel:
      w1: (hidden, input_dim)  == PyTorch fc1.weight
      b1: (hidden, 1)
      w2: (hidden, 1)          == fc2.weight.T
      b2: (1,)
    """
    k1, k2, k3, k4 = jax.random.split(key, 4)
    bound1 = 1.0 / jnp.sqrt(input_dim)
    bound2 = 1.0 / jnp.sqrt(hidden)
    w1 = jax.random.uniform(k1, (hidden, input_dim), jnp.float32, -bound1, bound1)
    b1 = jax.random.uniform(k2, (hidden, 1), jnp.float32, -bound1, bound1)
    w2 = jax.random.uniform(k3, (hidden, 1), jnp.float32, -bound2, bound2)
    b2 = jax.random.uniform(k4, (1,), jnp.float32, -bound2, bound2)
    return w1, b1, w2, b2


def _reference(x, w1, b1, w2, b2):
    h = jnp.maximum(x @ w1.T + b1[:, 0], 0.0)
    return h @ w2 + b2[0]


if __name__ == "__main__":
    key = jax.random.PRNGKey(0)
    kx, kp, kx2 = jax.random.split(key, 3)

    input_dim = 32
    hidden = 64
    w1, b1, w2, b2 = init_params(kp, input_dim, hidden)

    # 1) Small batch, single (partial) tile, f32.
    x = jax.random.normal(kx, (8, input_dim), jnp.float32)
    out = jax.block_until_ready(value_network_forward(x, w1, b1, w2, b2))
    ref = _reference(x, w1, b1, w2, b2)
    assert out.shape == (8, 1)
    assert jnp.allclose(out, ref, atol=1e-4, rtol=1e-4)

    # 2) Multi-tile ragged batch (no wrapper-side padding of x), f32.
    x2 = jax.random.normal(kx2, (200, input_dim), jnp.float32)
    out2 = jax.block_until_ready(
        value_network_forward(x2, w1, b1, w2, b2, tile_b=128))
    ref2 = _reference(x2, w1, b1, w2, b2)
    assert out2.shape == (200, 1)
    assert jnp.allclose(out2, ref2, atol=1e-4, rtol=1e-4)

    # 3) Caller-supplied bf16 x (no wrapper-side cast); weights stay f32.
    x3 = jax.random.normal(kx, (8, input_dim), jnp.bfloat16)
    out3 = jax.block_until_ready(value_network_forward(x3, w1, b1, w2, b2))
    ref3 = _reference(x3.astype(jnp.float32), w1, b1, w2, b2)
    assert out3.shape == (8, 1)
    assert jnp.allclose(out3, ref3, atol=1e-3, rtol=1e-3)

    print("KERNEL_OK")
</pallas_src>

<mosaic_0001>
module attributes {stable_mosaic.version = 11 : i64} {
  func.func @value_network_kernel(%arg0: i32, %arg1: memref<128x32xf32, #tpu.memory_space<vmem>>, %arg2: memref<64x32xf32, #tpu.memory_space<vmem>>, %arg3: memref<64x1xf32, #tpu.memory_space<vmem>>, %arg4: memref<64x1xf32, #tpu.memory_space<vmem>>, %arg5: memref<1xf32, #tpu.memory_space<smem>>, %arg6: memref<1x128xf32, #tpu.memory_space<vmem>>) attributes {dimension_semantics = [#tpu.dimension_semantics<parallel>], iteration_bounds = array<i64: 1>, scalar_prefetch = 0 : i64, scratch_operands = 0 : i64, tpu.core_type = #tpu.core_type<tc>, window_params = [{transform_indices = @transform_0, window_bounds = array<i64: 128, 32>}, {pipeline_mode = #tpu.pipeline_mode<synchronous>, transform_indices = @transform_1, window_bounds = array<i64: 64, 32>}, {pipeline_mode = #tpu.pipeline_mode<synchronous>, transform_indices = @transform_2, window_bounds = array<i64: 64, 1>}, {pipeline_mode = #tpu.pipeline_mode<synchronous>, transform_indices = @transform_3, window_bounds = array<i64: 64, 1>}, {transform_indices = @transform_4, window_bounds = array<i64: 1>}, {transform_indices = @transform_5, window_bounds = array<i64: 1, 128>}]} {
    %c0 = arith.constant 0 : index
    %c0_0 = arith.constant 0 : index
    %0 = vector.load %arg1[%c0, %c0_0] : memref<128x32xf32, #tpu.memory_space<vmem>>, vector<128x32xf32>
    %c0_1 = arith.constant 0 : index
    %c0_2 = arith.constant 0 : index
    %1 = vector.load %arg2[%c0_1, %c0_2] : memref<64x32xf32, #tpu.memory_space<vmem>>, vector<64x32xf32>
    %cst = arith.constant dense<0.000000e+00> : vector<64x128xf32>
    %2 = tpu.matmul %1, %0, %cst {dimension_numbers = #tpu.dot_dimension_numbers<[1], [1], [0], [0], [0, 0, 1, 0], [], []>} : vector<64x32xf32>, vector<128x32xf32>, vector<64x128xf32> -> vector<64x128xf32>
    %c0_3 = arith.constant 0 : index
    %c0_4 = arith.constant 0 : index
    %3 = vector.load %arg3[%c0_3, %c0_4] : memref<64x1xf32, #tpu.memory_space<vmem>>, vector<64x1xf32>
    %4 = vector.broadcast %3 : vector<64x1xf32> to vector<64x128xf32>
    %5 = arith.addf %2, %4 : vector<64x128xf32>
    %cst_5 = arith.constant 0.000000e+00 : f32
    %6 = vector.broadcast %cst_5 : f32 to vector<64x128xf32>
    %7 = arith.maximumf %5, %6 : vector<64x128xf32>
    %c0_6 = arith.constant 0 : index
    %c0_7 = arith.constant 0 : index
    %8 = vector.load %arg4[%c0_6, %c0_7] : memref<64x1xf32, #tpu.memory_space<vmem>>, vector<64x1xf32>
    %9 = vector.broadcast %8 : vector<64x1xf32> to vector<64x128xf32>
    %10 = arith.mulf %7, %9 : vector<64x128xf32>
    %cst_8 = arith.constant dense<0.000000e+00> : vector<128xf32>
    %11 = vector.multi_reduction <add>, %10, %cst_8 [0] : vector<64x128xf32> to vector<128xf32>
    %12 = vector.shape_cast %11 : vector<128xf32> to vector<1x128xf32>
    %c0_9 = arith.constant 0 : index
    %13 = memref.load %arg5[%c0_9] : memref<1xf32, #tpu.memory_space<smem>>
    %14 = vector.broadcast %13 : f32 to vector<1x128xf32>
    %15 = arith.addf %12, %14 : vector<1x128xf32>
    %c0_10 = arith.constant 0 : index
    %c0_11 = arith.constant 0 : index
    %16 = vector.load %arg6[%c0_10, %c0_11] : memref<1x128xf32, #tpu.memory_space<vmem>>, vector<1x128xf32>
    tpu.vector_store %arg6[%c0_10, %c0_11], %15 {strides = array<i32>} : memref<1x128xf32, #tpu.memory_space<vmem>>, vector<1x128xf32>,
    return
  }
  func.func @transform_0(%arg0: i32) -> (i32, i32) {
    %c0_i32 = arith.constant 0 : i32
    %c0_i32_0 = arith.constant 0 : i32
    return %arg0, %c0_i32 : i32, i32
  }
  func.func @transform_1(%arg0: i32) -> (i32, i32) {
    %c0_i32 = arith.constant 0 : i32
    %c0_i32_0 = arith.constant 0 : i32
    %c0_i32_1 = arith.constant 0 : i32
    return %c0_i32, %c0_i32_0 : i32, i32
  }
  func.func @transform_2(%arg0: i32) -> (i32, i32) {
    %c0_i32 = arith.constant 0 : i32
    %c0_i32_0 = arith.constant 0 : i32
    %c0_i32_1 = arith.constant 0 : i32
    return %c0_i32, %c0_i32_0 : i32, i32
  }
  func.func @transform_3(%arg0: i32) -> (i32, i32) {
    %c0_i32 = arith.constant 0 : i32
    %c0_i32_0 = arith.constant 0 : i32
    %c0_i32_1 = arith.constant 0 : i32
    return %c0_i32, %c0_i32_0 : i32, i32
  }
  func.func @transform_4(%arg0: i32) -> i32 {
    %c0_i32 = arith.constant 0 : i32
    %c0_i32_0 = arith.constant 0 : i32
    return %c0_i32 : i32
  }
  func.func @transform_5(%arg0: i32) -> (i32, i32) {
    %c0_i32 = arith.constant 0 : i32
    %c0_i32_0 = arith.constant 0 : i32
    return %c0_i32, %arg0 : i32, i32
  }
}

</mosaic_0001>

<bundles_post_ra>
// kernel: tpu_custom_call.1
= control target key start
LH: loop header
LB: loop body
LE: loop exit
PB: predicated region body
PF: predicated region fallthrough
CT: control target
= control target key end

     0   :  { %vm94_vm0 = vcmask 261120   ;;  %v551_v6 = vmov 0   ;;  %s796_s0 = inlined_call_operand.vmem [shape: f32[8,32], index: 0, kind: input, shape index: {}]   ;;  %s797_s1 = inlined_call_operand.vmem [shape: f32[64,32], index: 1, kind: input, shape index: {}]   ;;  %s798_s2 = inlined_call_operand.vmem [shape: f32[64,1], index: 2, kind: input, shape index: {}]   ;;  %s799_s3 = inlined_call_operand.vmem [shape: f32[64,1], index: 3, kind: input, shape index: {}]   ;;  %s800_s4 = inlined_call_operand.<no memory space> [shape: f32[1], index: 4, kind: input, shape index: {}]   ;;  %s801_s5 = inlined_call_operand.hbm [shape: f32[1,8], index: 5, kind: output, shape index: {}]  }
   0x1   :  { %v22_v0 = vld [vmem:[%s796_s0] sm:$0xff]  ;;  %v23_v1 = vld [vmem:[%s796_s0 + $0x8] sm:$0xff]  ;;  %v24_v2 = vld [vmem:[%s796_s0 + $0x10] sm:$0xff]  ;;  %525 = vset.pattern.permute.xlu0 %v551_v6  ;;  %526 = vset.pattern.permute.xlu1 %v551_v6 }
   0x2   :  { %v459_v3 = vpack.c.bf16 %v23_v1, %v22_v0  ;;  %vm594_vm1 = vmpackc.low %vm94_vm0, %vm94_vm0  ;;  %v25_v5 = vld [vmem:[%s796_s0 + $0x18] sm:$0xff]  ;;  %v38_v8 = vld [vmem:[%s797_s1] sm:$0xff] }
   0x3   :  { %v465_v7 = vpack.c.bf16 %v25_v5, %v24_v2  ;;  %v26_v9 = vld [vmem:[%s796_s0 + $0x20] sm:$0xff]  ;;  %v27_v10 = vld [vmem:[%s796_s0 + $0x28] sm:$0xff]  ;;  %447 = vmatprep.mubr.msk.f32.mxu0 %vm94_vm0, %v38_v8  ;;  %v48_v13 = vld [vmem:[%s798_s2 + $0x10] sm:$0xff] }
   0x4   :  { %461 = vmatprep.subr.msk.bf16.mxu0 %vm594_vm1, %v459_v3  ;;  %507 = vmatprep.subr.msk.bf16.mxu1 %vm594_vm1, %v459_v3  ;;  %v42_v11 = vld [vmem:[%s797_s1 + $0x20] sm:$0xff]  ;;  %v471_v14 = vpack.c.bf16 %v27_v10, %v26_v9  ;;  %v47_v15 = vld [vmem:[%s798_s2 + $0x8] sm:$0xff]  ;;  %v49_v16 = vld [vmem:[%s798_s2 + $0x18] sm:$0xff] }
   0x5   :  { %464 = vmatpush3.bf16.xpose.msk.msra.mxu0 %vm594_vm1, %v459_v3  ;;  %515 = vmatpush3.bf16.xpose.msk.msra.mxu1 %vm594_vm1, %v459_v3  ;;  %v46_v12 = vld [vmem:[%s798_s2] sm:$0xff] }
   0x6   :  { %467 = vmatprep.subr.msk.bf16.mxu0 %vm594_vm1, %v465_v7  ;;  %508 = vmatprep.subr.msk.bf16.mxu1 %vm594_vm1, %v465_v7 }
   0x7   :  { %453 = vmatprep.mubr.msk.f32.mxu1 %vm94_vm0, %v42_v11  ;;  %56 = vperm.xlu0 %525, %v46_v12  }
   0x8   :  { %66 = vperm.xlu1 %526, %v48_v13  }
   0xd   :  { %470 = vmatpush3.bf16.xpose.msk.msra.mxu0 %vm594_vm1, %v465_v7  ;;  %516 = vmatpush3.bf16.xpose.msk.msra.mxu1 %vm594_vm1, %v465_v7 }
   0xe   :  { %473 = vmatprep.subr.msk.bf16.mxu0 %vm594_vm1, %v471_v14  ;;  %509 = vmatprep.subr.msk.bf16.mxu1 %vm594_vm1, %v471_v14 }
   0xf   :  { %11 = vsyncpa [#allocation4], 0  ;;  %v28_v17 = vld [vmem:[%s796_s0 + $0x30] sm:$0xff]  ;;  %v29_v18 = vld [vmem:[%s796_s0 + $0x38] sm:$0xff]  ;;  %61 = vperm.xlu0 %525, %v47_v15   ;;  %71 = vperm.xlu1 %526, %v49_v16   ;;  %s552_s21 = smov [#allocation3]  }
  0x10   :  { %v280_v19 = vld [vmem:[%s799_s3] sm:$0xff]  ;;  %v281_v20 = vld [vmem:[%s799_s3 + $0x8] sm:$0xff]  ;;  %v477_v21 = vpack.c.bf16 %v29_v18, %v28_v17  ;;  %v282_v23 = vld [vmem:[%s799_s3 + $0x10] sm:$0xff]  ;;  %s359_s22 = sshll.u32 %s552_s21, 4  ;;  %s360_s22 = int_to_ptr.vmem [resolvable:$true] %s359_s22 }
  0x11   :  { %v50_v22 = vld [vmem:[%s798_s2 + $0x20] sm:$0xff]  ;;  %v31_v25 = vld [vmem:[%s796_s0 + $0x48] sm:$0xff]  ;;  %v283_v27 = vld [vmem:[%s799_s3 + $0x18] sm:$0xff]  ;;  %s527_s23 = scalar_lea.vmem %s360_s22, 16  ;;  %s531_s24 = scalar_lea.vmem %s360_s22, 32 }
  0x12   :  { %v30_v24 = vld [vmem:[%s796_s0 + $0x40] sm:$0xff]  ;;  %v51_v26 = vld [vmem:[%s798_s2 + $0x28] sm:$0xff]  ;;  %v52_v29 = vld [vmem:[%s798_s2 + $0x30] sm:$0xff]  ;;  %p528_p0 = scmp.ne.s32.totalorder %s360_s22, %s527_s23  ;;  %p532_p1 = scmp.lt.s32.totalorder %s360_s22, %s360_s22 }
  0x13   :  { %290 = vperm.xlu0 %525, %v280_v19   ;;  %295 = vperm.xlu1 %526, %v281_v20   ;;  %v483_v28 = vpack.c.bf16 %v31_v25, %v30_v24  ;;  %v284_v30 = vld [vmem:[%s799_s3 + $0x20] sm:$0xff]  ;;  %v32_v31 = vld [vmem:[%s796_s0 + $0x50] sm:$0xff]  ;;  %v33_v32 = vld [vmem:[%s796_s0 + $0x58] sm:$0xff]  ;;  %p533_p2 = scmp.lt.s32.totalorder %s531_s24, %s527_s23 }
  0x14   :  { %v53_v33 = vld [vmem:[%s798_s2 + $0x38] sm:$0xff]  ;;  %v285_v34 = vld [vmem:[%s799_s3 + $0x28] sm:$0xff]  ;;  %v489_v35 = vpack.c.bf16 %v33_v32, %v32_v31  ;;  %v286_v36 = vld [vmem:[%s799_s3 + $0x30] sm:$0xff] }
  0x15   :  { %476 = vmatpush3.bf16.xpose.msk.msra.mxu0 %vm594_vm1, %v471_v14  ;;  %517 = vmatpush3.bf16.xpose.msk.msra.mxu1 %vm594_vm1, %v471_v14  ;;  %v287_v37 = vld [vmem:[%s799_s3 + $0x38] sm:$0xff]  ;;  %v34_v38 = vld [vmem:[%s796_s0 + $0x60] sm:$0xff]  ;;  %v35_v39 = vld [vmem:[%s796_s0 + $0x68] sm:$0xff]  ;;  %p534_p3 = por %p533_p2, %p532_p1 }
  0x16   :  { %479 = vmatprep.subr.msk.bf16.mxu0 %vm594_vm1, %v477_v21  ;;  %510 = vmatprep.subr.msk.bf16.mxu1 %vm594_vm1, %v477_v21  ;;  %v495_v40 = vpack.c.bf16 %v35_v39, %v34_v38  ;;  %v36_v41 = vld [vmem:[%s796_s0 + $0x70] sm:$0xff]  ;;  %v37_v42 = vld [vmem:[%s796_s0 + $0x78] sm:$0xff]  ;;  %v39_v44 = vld [vmem:[%s797_s1 + $0x8] sm:$0xff] }
  0x17   :  { %76 = vperm.xlu0 %525, %v50_v22   ;;  %300 = vperm.xlu1 %526, %v282_v23   ;;  %v501_v43 = vpack.c.bf16 %v37_v42, %v36_v41  ;;  %v43_v45 = vld [vmem:[%s797_s1 + $0x28] sm:$0xff]  ;;  %v40_v46 = vld [vmem:[%s797_s1 + $0x10] sm:$0xff]  ;;  %v41_v48 = vld [vmem:[%s797_s1 + $0x18] sm:$0xff]  ;;  %p535_p4 = pnand %p534_p3, %p528_p0 }
  0x18   :  { %v44_v47 = vld [vmem:[%s797_s1 + $0x30] sm:$0xff]  ;;  %v45_v49 = vld [vmem:[%s797_s1 + $0x38] sm:$0xff] }
  0x1b   :  { %81 = vperm.xlu0 %525, %v51_v26   ;;  %305 = vperm.xlu1 %526, %v283_v27  }
  0x1d   :  { %482 = vmatpush3.bf16.xpose.msk.msra.mxu0 %vm594_vm1, %v477_v21  ;;  %518 = vmatpush3.bf16.xpose.msk.msra.mxu1 %vm594_vm1, %v477_v21 }
  0x1e   :  { %485 = vmatprep.subr.msk.bf16.mxu0 %vm594_vm1, %v483_v28  ;;  %511 = vmatprep.subr.msk.bf16.mxu1 %vm594_vm1, %v483_v28 }
  0x1f   :  { %86 = vperm.xlu0 %525, %v52_v29   ;;  %310 = vperm.xlu1 %526, %v284_v30  }
  0x23   :  { %91 = vperm.xlu0 %525, %v53_v33   ;;  %315 = vperm.xlu1 %526, %v285_v34  }
  0x25   :  { %488 = vmatpush3.bf16.xpose.msk.msra.mxu0 %vm594_vm1, %v483_v28  ;;  %519 = vmatpush3.bf16.xpose.msk.msra.mxu1 %vm594_vm1, %v483_v28 }
  0x26   :  { %491 = vmatprep.subr.msk.bf16.mxu0 %vm594_vm1, %v489_v35  ;;  %512 = vmatprep.subr.msk.bf16.mxu1 %vm594_vm1, %v489_v35 }
  0x27   :  { %320 = vperm.xlu0 %525, %v286_v36   ;;  %325 = vperm.xlu1 %526, %v287_v37  }
  0x2d   :  { %494 = vmatpush3.bf16.xpose.msk.msra.mxu0 %vm594_vm1, %v489_v35  ;;  %520 = vmatpush3.bf16.xpose.msk.msra.mxu1 %vm594_vm1, %v489_v35 }
  0x2e   :  { %497 = vmatprep.subr.msk.bf16.mxu0 %vm594_vm1, %v495_v40  ;;  %513 = vmatprep.subr.msk.bf16.mxu1 %vm594_vm1, %v495_v40 }
  0x35   :  { %500 = vmatpush3.bf16.xpose.msk.msra.mxu0 %vm594_vm1, %v495_v40  ;;  %521 = vmatpush3.bf16.xpose.msk.msra.mxu1 %vm594_vm1, %v495_v40 }
  0x36   :  { %503 = vmatprep.subr.msk.bf16.mxu0 %vm594_vm1, %v501_v43  ;;  %514 = vmatprep.subr.msk.bf16.mxu1 %vm594_vm1, %v501_v43 }
  0x3d   :  { %506 = vmatpush3.bf16.xpose.msk.msra.mxu0 %vm594_vm1, %v501_v43  ;;  %522 = vmatpush3.bf16.xpose.msk.msra.mxu1 %vm594_vm1, %v501_v43 }
  0x44   :  { %448 = vmatmul.mubr.msk.f32.vlgmr.msra.gmra.mrb[0].mxu0 %vm94_vm0, %v39_v44  ;;  %454 = vmatmul.mubr.msk.f32.vlgmr.msra.gmra.mrb[0].mxu1 %vm94_vm0, %v43_v45 }
  0x45   :  { %450 = vmatprep.mubr.msk.f32.mxu0 %vm94_vm0, %v40_v46  ;;  %456 = vmatprep.mubr.msk.f32.mxu1 %vm94_vm0, %v44_v47  ;;  %v350_v46 = vstv %s800_s4 }
  0x48   :  { %451 = vmatmul.mubr.msk.f32.gmra.mrb[2].mxu0 %vm94_vm0, %v41_v48  ;;  %457 = vmatmul.mubr.msk.f32.gmra.mrb[2].mxu1 %vm94_vm0, %v45_v49 }
  0x86   :  { %v57_v50 = vpop.permute.xlu0 %56 }
  0x87   :  { %v67_v51 = vpop.permute.xlu1 %66 }
  0x8e   :  { %v62_v52 = vpop.permute.xlu0 %61  ;;  %v72_v53 = vpop.permute.xlu1 %71 }
  0x92   :  { %v291_v54 = vpop.permute.xlu0 %290  ;;  %v296_v55 = vpop.permute.xlu1 %295 }
  0x96   :  { %v77_v56 = vpop.permute.xlu0 %76  ;;  %v301_v57 = vpop.permute.xlu1 %300 }
  0x9a   :  { %v82_v58 = vpop.permute.xlu0 %81  ;;  %v306_v59 = vpop.permute.xlu1 %305 }
  0x9e   :  { %v87_v2 = vpop.permute.xlu0 %86  ;;  %v311_v14 = vpop.permute.xlu1 %310 }
  0xa2   :  { %v92_v22 = vpop.permute.xlu0 %91  ;;  %v316_v27 = vpop.permute.xlu1 %315 }
  0xa6   :  { %v321_v34 = vpop.permute.xlu0 %320  ;;  %v326_v37 = vpop.permute.xlu1 %325 }
 0x117   :  { %v449_v60 = vpop.f32.mrb[0].mxu0  ;;  %v455_v61 = vpop.f32.mrb[0].mxu1 }
 0x118   :  { %v239_v62 = vadd.f32 %v449_v60, %v62_v52  ;;  %v233_v63 = vpop.f32.mrb[1].mxu0  ;;  %v253_v0 = vpop.f32.mrb[1].mxu1  ;;  %v259_v15 = vadd.f32 %v455_v61, %v82_v58 }
 0x119   :  { %v234_v1 = vadd.f32 %v233_v63, %v57_v50  ;;  %v254_v12 = vadd.f32 %v253_v0, %v77_v56 }
 0x11a   :  { %v273_v3 = vmax.f32 %v239_v62, 0.0  ;;  %v277_v23 = vmax.f32 %v259_v15, 0.0 }
 0x11b   :  { %v272_v4 = vmax.f32 %v234_v1, 0.0  ;;  %v452_v5 = vpop.f32.mrb[2].mxu0  ;;  %v458_v6 = vpop.f32.mrb[2].mxu1  ;;  %v276_v19 = vmax.f32 %v254_v12, 0.0 }
 0x11c   :  { %v329_v7 = vmul.f32 %v296_v55, %v273_v3  ;;  %v249_v8 = vadd.f32 %v452_v5, %v72_v53  ;;  %v243_v9 = vpop.f32.mrb[3].mxu0  ;;  %v263_v10 = vpop.f32.mrb[3].mxu1  ;;  %v269_v25 = vadd.f32 %v458_v6, %v92_v22  ;;  %v333_v31 = vmul.f32 %v316_v27, %v277_v23 }
 0x11d   :  { %v328_v11 = vmul.f32 %v291_v54, %v272_v4  ;;  %v244_v13 = vadd.f32 %v243_v9, %v67_v51  ;;  %v264_v21 = vadd.f32 %v263_v10, %v87_v2  ;;  %v332_v28 = vmul.f32 %v311_v14, %v276_v19 }
 0x11e   :  { %v275_v17 = vmax.f32 %v249_v8, 0.0  ;;  %v279_v32 = vmax.f32 %v269_v25, 0.0 }
 0x11f   :  { %v336_v16 = vadd.f32 %v329_v7, %v328_v11  ;;  %v274_v18 = vmax.f32 %v244_v13, 0.0  ;;  %v278_v30 = vmax.f32 %v264_v21, 0.0 }
 0x120   :  { %v331_v24 = vmul.f32 %v306_v59, %v275_v17  ;;  %v335_v38 = vmul.f32 %v326_v37, %v279_v32 }
 0x121   :  { %v330_v20 = vmul.f32 %v301_v57, %v274_v18  ;;  %v334_v35 = vmul.f32 %v321_v34, %v278_v30 }
 0x123   :  { %v337_v26 = vadd.f32 %v336_v16, %v330_v20 }
 0x125   :  { %v338_v29 = vadd.f32 %v337_v26, %v331_v24 }
 0x127   :  { %v339_v33 = vadd.f32 %v338_v29, %v332_v28 }
 0x129   :  { %v340_v36 = vadd.f32 %v339_v33, %v333_v31 }
 0x12b   :  { %v341_v39 = vadd.f32 %v340_v36, %v334_v35 }
 0x12d   :  { %v342_v40 = vadd.f32 %v341_v39, %v335_v38 }
 0x12f   :  { %v343_v41 = vrot.slane %v342_v40, 4 }
 0x131   :  { %v344_v42 = vadd.f32 %v343_v41, %v342_v40 }
 0x133   :  { %v345_v43 = vrot.slane %v344_v42, 2 }
 0x135   :  { %v346_v44 = vadd.f32 %v345_v43, %v344_v42 }
 0x137   :  { %v347_v45 = vrot.slane %v346_v44, 1 }
 0x139   :  { %v348_v47 = vadd.f32 %v347_v45, %v346_v44 }
 0x13b   :  { %v351_v48 = vadd.f32 %v350_v46, %v348_v47 }
 0x13d   :  { %352 = vst [vmem:[#allocation3] sm:$0x1] %v351_v48 }
 0x13e   :  { %538 = shalt.err (!%p535_p4)
}
 0x13f   :  { %s539_s27 = scalar_lea.hbm %s801_s5, 16 }
 0x140   :  { %p540_p5 = scmp.ne.s32.totalorder %s801_s5, %s539_s27  ;;  %p543_p6 = scmp.lt.u32.totalorder %s539_s27, %s801_s5 }
 0x142   :  { %p545_p7 = pnand %p543_p6, %p540_p5 }
 0x144   :  { %548 = shalt.err (!%p545_p7)
}
 0x145   :  { %362 = dma.vmem_to_hbm [thread:$0]  %s360_s22, 16, %s801_s5, [#allocation4]  }
 0x146   :  { %549 = dma.done.wait [#allocation4], 16  }
 0x147   :  { %550 = vsyncadd [#allocation4], 4294967280 }
 0x148   :  { %366 = vsyncpa [#allocation4], 1 }

</bundles_post_ra>
